<compile_context>
chip_gen: v6e
topology: v6e:2x2x1
jax: 0.10.0
libtpu: 0.0.40
codegen_flags: <defaults>
</compile_context>

<pallas_src>
import jax
import jax.numpy as jnp
from jax.experimental import pallas as pl
from jax.experimental.pallas import tpu as pltpu

IN_F = 67
HID_F = 32
PAD_F = 128                # lane-dense output slab width (one full vreg of lanes)
DEC_END = IN_F             # dec occupies lanes [0, 67)
ENC_END = IN_F + HID_F     # enc occupies lanes [67, 99); lanes [99,128) are zero pad
NEG_SLOPE = 0.01           # nn.LeakyReLU() default
MAX_TB = 2048              # batch tile (rows); multiple of 8, fits all VMEM budgets


def join_nn_kernel(x_ref, w1_ref, b1_ref, w2_ref, b2_ref, out_ref):
    # x_ref:  [TB, 67]   w1_ref: [67, 32]  b1_ref: [1, 32]
    # w2_ref: [32, 67]   b2_ref: [1, 67]   out_ref: [TB, 128]  (dec | enc | pad)
    x = x_ref[...]

    # encoder: Linear(67 -> 32) + LeakyReLU  (MXU matmul, f32 accumulate)
    h = jnp.dot(x, w1_ref[...], preferred_element_type=jnp.float32)
    h = h + b1_ref[...].astype(jnp.float32)
    enc = jnp.where(h > 0, h, NEG_SLOPE * h)

    # decoder: Linear(32 -> 67)
    dec = jnp.dot(enc.astype(w2_ref.dtype), w2_ref[...],
                  preferred_element_type=jnp.float32)
    dec = dec + b2_ref[...].astype(jnp.float32)

    # Pack both results into one lane-dense 128-wide slab so the epilogue store
    # is an unmasked vst instead of two masked partial stores.
    tb = x.shape[0]
    pad = jnp.zeros((tb, PAD_F - ENC_END), dtype=jnp.float32)
    out_ref[...] = jnp.concatenate([dec, enc, pad], axis=-1).astype(out_ref.dtype)


def _batch_tile(B: int) -> int:
    if B <= MAX_TB:
        return B          # full-extent block is always legal
    return MAX_TB         # multiple of 8; trailing partial block is padded by Pallas


def join_nn_forward(x, w1, b1, w2, b2):
    """Returns (dec, enc), matching Join_NN.forward."""
    B = x.shape[0]
    TB = _batch_tile(B)
    grid = (pl.cdiv(B, TB),)

    slab = pl.pallas_call(
        join_nn_kernel,
        out_shape=jax.ShapeDtypeStruct((B, PAD_F), x.dtype),
        grid=grid,
        in_specs=[
            pl.BlockSpec((TB, IN_F), lambda i: (i, 0)),        # x: tiled over batch
            pl.BlockSpec((IN_F, HID_F), lambda i: (0, 0)),     # w1: VMEM-resident
            pl.BlockSpec((1, HID_F), lambda i: (0, 0)),        # b1
            pl.BlockSpec((HID_F, IN_F), lambda i: (0, 0)),     # w2
            pl.BlockSpec((1, IN_F), lambda i: (0, 0)),         # b2
        ],
        out_specs=pl.BlockSpec((TB, PAD_F), lambda i: (i, 0)),
        compiler_params=pltpu.CompilerParams(
            dimension_semantics=("parallel",),                  # megacore on v7x
        ),
    )(x, w1, b1, w2, b2)

    # Layout plumbing: callers that can consume the packed slab directly should,
    # to avoid this extra slice copy.
    dec = slab[:, :DEC_END]
    enc = slab[:, DEC_END:ENC_END]
    return dec, enc


def _reference(x, w1, b1, w2, b2):
    h = x @ w1 + b1
    enc = jnp.where(h > 0, h, NEG_SLOPE * h)
    dec = enc @ w2 + b2
    return dec, enc


if __name__ == "__main__":
    key = jax.random.PRNGKey(0)
    kx, k1, k2, k3, k4 = jax.random.split(key, 5)

    # Deterministic synthetic parameters (PyTorch-style uniform init bounds).
    bound1 = 1.0 / jnp.sqrt(IN_F)
    bound2 = 1.0 / jnp.sqrt(HID_F)
    w1 = jax.random.uniform(k1, (IN_F, HID_F), jnp.float32, -bound1, bound1)
    b1 = jax.random.uniform(k2, (1, HID_F), jnp.float32, -bound1, bound1)
    w2 = jax.random.uniform(k3, (HID_F, IN_F), jnp.float32, -bound2, bound2)
    b2 = jax.random.uniform(k4, (1, IN_F), jnp.float32, -bound2, bound2)

    # Small primary check (B = 8).
    B = 8
    x = jax.random.normal(kx, (B, IN_F), dtype=jnp.float32)
    dec, enc = join_nn_forward(x, w1, b1, w2, b2)
    jax.block_until_ready((dec, enc))

    dec_ref, enc_ref = _reference(x, w1, b1, w2, b2)
    assert dec.shape == (B, IN_F) and enc.shape == (B, HID_F)
    assert jnp.allclose(enc, enc_ref, atol=1e-5, rtol=1e-5)
    assert jnp.allclose(dec, dec_ref, atol=1e-5, rtol=1e-5)

    print("KERNEL_OK")
</pallas_src>

<mosaic_0001>
module attributes {stable_mosaic.version = 11 : i64} {
  func.func @join_nn_kernel(%arg0: i32, %arg1: memref<8x67xf32, #tpu.memory_space<vmem>>, %arg2: memref<67x32xf32, #tpu.memory_space<vmem>>, %arg3: memref<1x32xf32, #tpu.memory_space<vmem>>, %arg4: memref<32x67xf32, #tpu.memory_space<vmem>>, %arg5: memref<1x67xf32, #tpu.memory_space<vmem>>, %arg6: memref<8x128xf32, #tpu.memory_space<vmem>>) attributes {dimension_semantics = [#tpu.dimension_semantics<parallel>], iteration_bounds = array<i64: 1>, scalar_prefetch = 0 : i64, scratch_operands = 0 : i64, tpu.core_type = #tpu.core_type<tc>, window_params = [{transform_indices = @transform_0, window_bounds = array<i64: 8, 67>}, {pipeline_mode = #tpu.pipeline_mode<synchronous>, transform_indices = @transform_1, window_bounds = array<i64: 67, 32>}, {pipeline_mode = #tpu.pipeline_mode<synchronous>, transform_indices = @transform_2, window_bounds = array<i64: 1, 32>}, {pipeline_mode = #tpu.pipeline_mode<synchronous>, transform_indices = @transform_3, window_bounds = array<i64: 32, 67>}, {pipeline_mode = #tpu.pipeline_mode<synchronous>, transform_indices = @transform_4, window_bounds = array<i64: 1, 67>}, {transform_indices = @transform_5, window_bounds = array<i64: 8, 128>}]} {
    %c0 = arith.constant 0 : index
    %c0_0 = arith.constant 0 : index
    %0 = vector.load %arg1[%c0, %c0_0] : memref<8x67xf32, #tpu.memory_space<vmem>>, vector<8x67xf32>
    %c0_1 = arith.constant 0 : index
    %c0_2 = arith.constant 0 : index
    %1 = vector.load %arg2[%c0_1, %c0_2] : memref<67x32xf32, #tpu.memory_space<vmem>>, vector<67x32xf32>
    %cst = arith.constant dense<0.000000e+00> : vector<8x32xf32>
    %2 = tpu.matmul %0, %1, %cst {dimension_numbers = #tpu.dot_dimension_numbers<[1], [0], [0], [1], [0, 0, 1, 1], [], []>} : vector<8x67xf32>, vector<67x32xf32>, vector<8x32xf32> -> vector<8x32xf32>
    %c0_3 = arith.constant 0 : index
    %c0_4 = arith.constant 0 : index
    %3 = vector.load %arg3[%c0_3, %c0_4] : memref<1x32xf32, #tpu.memory_space<vmem>>, vector<1x32xf32>
    %4 = vector.broadcast %3 : vector<1x32xf32> to vector<8x32xf32>
    %5 = arith.addf %2, %4 : vector<8x32xf32>
    %cst_5 = arith.constant 0.000000e+00 : f32
    %6 = vector.broadcast %cst_5 : f32 to vector<8x32xf32>
    %7 = arith.cmpf ogt, %5, %6 : vector<8x32xf32>
    %cst_6 = arith.constant 0.00999999977 : f32
    %8 = vector.broadcast %cst_6 : f32 to vector<8x32xf32>
    %9 = arith.mulf %8, %5 : vector<8x32xf32>
    %10 = arith.select %7, %5, %9 : vector<8x32xi1>, vector<8x32xf32>
    %c0_7 = arith.constant 0 : index
    %c0_8 = arith.constant 0 : index
    %11 = vector.load %arg4[%c0_7, %c0_8] : memref<32x67xf32, #tpu.memory_space<vmem>>, vector<32x67xf32>
    %cst_9 = arith.constant dense<0.000000e+00> : vector<8x67xf32>
    %12 = tpu.matmul %10, %11, %cst_9 {dimension_numbers = #tpu.dot_dimension_numbers<[1], [0], [0], [1], [0, 0, 1, 1], [], []>} : vector<8x32xf32>, vector<32x67xf32>, vector<8x67xf32> -> vector<8x67xf32>
    %c0_10 = arith.constant 0 : index
    %c0_11 = arith.constant 0 : index
    %13 = vector.load %arg5[%c0_10, %c0_11] : memref<1x67xf32, #tpu.memory_space<vmem>>, vector<1x67xf32>
    %14 = vector.broadcast %13 : vector<1x67xf32> to vector<8x67xf32>
    %15 = arith.addf %12, %14 : vector<8x67xf32>
    %cst_12 = arith.constant 0.000000e+00 : f32
    %16 = vector.broadcast %cst_12 : f32 to vector<8x29xf32>
    %17 = tpu.concatenate %15, %10, %16 in 1 : vector<8x67xf32>, vector<8x32xf32>, vector<8x29xf32> -> vector<8x128xf32>
    %c0_13 = arith.constant 0 : index
    %c0_14 = arith.constant 0 : index
    %18 = vector.load %arg6[%c0_13, %c0_14] : memref<8x128xf32, #tpu.memory_space<vmem>>, vector<8x128xf32>
    tpu.vector_store %arg6[%c0_13, %c0_14], %17 {strides = array<i32>} : memref<8x128xf32, #tpu.memory_space<vmem>>, vector<8x128xf32>,
    return
  }
  func.func @transform_0(%arg0: i32) -> (i32, i32) {
    %c0_i32 = arith.constant 0 : i32
    %c0_i32_0 = arith.constant 0 : i32
    return %arg0, %c0_i32 : i32, i32
  }
  func.func @transform_1(%arg0: i32) -> (i32, i32) {
    %c0_i32 = arith.constant 0 : i32
    %c0_i32_0 = arith.constant 0 : i32
    %c0_i32_1 = arith.constant 0 : i32
    return %c0_i32, %c0_i32_0 : i32, i32
  }
  func.func @transform_2(%arg0: i32) -> (i32, i32) {
    %c0_i32 = arith.constant 0 : i32
    %c0_i32_0 = arith.constant 0 : i32
    %c0_i32_1 = arith.constant 0 : i32
    return %c0_i32, %c0_i32_0 : i32, i32
  }
  func.func @transform_3(%arg0: i32) -> (i32, i32) {
    %c0_i32 = arith.constant 0 : i32
    %c0_i32_0 = arith.constant 0 : i32
    %c0_i32_1 = arith.constant 0 : i32
    return %c0_i32, %c0_i32_0 : i32, i32
  }
  func.func @transform_4(%arg0: i32) -> (i32, i32) {
    %c0_i32 = arith.constant 0 : i32
    %c0_i32_0 = arith.constant 0 : i32
    %c0_i32_1 = arith.constant 0 : i32
    return %c0_i32, %c0_i32_0 : i32, i32
  }
  func.func @transform_5(%arg0: i32) -> (i32, i32) {
    %c0_i32 = arith.constant 0 : i32
    %c0_i32_0 = arith.constant 0 : i32
    return %arg0, %c0_i32 : i32, i32
  }
}

</mosaic_0001>

<bundles_post_ra>
// kernel: tpu_custom_call.1
= control target key start
LH: loop header
LB: loop body
LE: loop exit
PB: predicated region body
PF: predicated region fallthrough
CT: control target
= control target key end

     0   :  { %vm42_vm0 = vcmask 1042432   ;;  %v303_v1 = vmov 0.0   ;;  %vm304_vm1 = vmmov 0   ;;  %s390_s0 = inlined_call_operand.vmem [shape: f32[8,67], index: 0, kind: input, shape index: {}]   ;;  %s391_s1 = inlined_call_operand.vmem [shape: f32[67,32], index: 1, kind: input, shape index: {}]   ;;  %s392_s2 = inlined_call_operand.vmem [shape: f32[1,32], index: 2, kind: input, shape index: {}]   ;;  %s393_s3 = inlined_call_operand.vmem [shape: f32[32,67], index: 3, kind: input, shape index: {}]   ;;  %s394_s4 = inlined_call_operand.vmem [shape: f32[1,67], index: 4, kind: input, shape index: {}]   ;;  %s395_s5 = inlined_call_operand.hbm [shape: f32[8,128], index: 5, kind: output, shape index: {}]  }
   0x1   :  { %v30_v0 = vld [vmem:[%s391_s1 + $0x40] sm:$0x7]  ;;  %245 = vmatprep.subr.mxu0 %v303_v1  ;;  %v29_v2 = vld [vmem:[%s391_s1 + $0x38] sm:$0xff]  ;;  %266 = vmatprep.subr.mxu1 %v303_v1  ;;  %v28_v3 = vld [vmem:[%s391_s1 + $0x30] sm:$0xff] }
   0x2   :  { %246 = vmatpush3.msk.msra.mxu0 %vm42_vm0, %v30_v0  ;;  %263 = vmatprep.mubr.msk.f32.mxu0 %vm304_vm1, %v303_v1  ;;  %v122_v4 = vld [vmem:[%s393_s3 + $0x18] sm:$0xff] }
   0x3   :  { %247 = vmatprep.subr.mxu0 %v303_v1  ;;  %274 = vmatprep.mubr.msk.f32.mxu1 %vm304_vm1, %v303_v1 }
   0x4   :  { %248 = vmatpush3.msra.mxu0 %v29_v2  ;;  %267 = vmatpush3.msra.mxu1 %v122_v4 }
   0x5   :  { %10 = vsyncpa [#allocation3], 0  ;;  %249 = vmatprep.subr.mxu0 %v303_v1  ;;  %v27_v5 = vld [vmem:[%s391_s1 + $0x28] sm:$0xff]  ;;  %268 = vmatprep.subr.mxu1 %v303_v1  ;;  %v26_v6 = vld [vmem:[%s391_s1 + $0x20] sm:$0xff]  ;;  %vm38_vm2 = vcmask 547840   ;;  %vm130_vm4 = vcmask 261120  }
   0x6   :  { %250 = vmatpush3.msra.mxu0 %v28_v3  ;;  %v25_v7 = vld [vmem:[%s391_s1 + $0x18] sm:$0xff]  ;;  %v24_v8 = vld [vmem:[%s391_s1 + $0x10] sm:$0xff]  ;;  %v23_v9 = vld [vmem:[%s391_s1 + $0x8] sm:$0xff]  ;;  %s305_s21 = smov 67   ;;  %vm208_vm5 = vcmask 809984  }
   0x7   :  { %251 = vmatprep.subr.mxu0 %v303_v1  ;;  %v22_v10 = vld [vmem:[%s391_s1] sm:$0xff]  ;;  %v121_v12 = vld [vmem:[%s393_s3 + $0x10] sm:$0xff]  ;;  %v120_v13 = vld [vmem:[%s393_s3 + $0x8] sm:$0xff] }
   0x8   :  { %252 = vmatpush3.msra.mxu0 %v27_v5  ;;  %v21_v11 = vld [vmem:[%s390_s0] sm:$0xff]  ;;  %269 = vmatpush3.msra.mxu1 %v121_v12 }
   0x9   :  { %253 = vmatprep.subr.mxu0 %v303_v1  ;;  %270 = vmatprep.subr.mxu1 %v303_v1  ;;  %v119_v14 = vld [vmem:[%s393_s3] sm:$0xff]  ;;  %s306_s3 = smov [#allocation2]  }
   0xa   :  { %254 = vmatpush3.msra.mxu0 %v26_v6  ;;  %271 = vmatpush3.msra.mxu1 %v120_v13  ;;  %v225_v15 = vld [vmem:[%s392_s2] ss:$0 sm:$0xff]  ;;  %s217_s24 = sshll.u32 %s306_s3, 4  ;;  %s218_s24 = int_to_ptr.vmem [resolvable:$true] %s217_s24 }
   0xb   :  { %255 = vmatprep.subr.mxu0 %v303_v1  ;;  %272 = vmatprep.subr.mxu1 %v303_v1  ;;  %v228_v21 = vld [vmem:[%s394_s4] ss:$0 sm:$0xff]  ;;  %s281_s2 = scalar_lea.vmem %s218_s24, 128  ;;  %p286_p1 = scmp.lt.s32.totalorder %s218_s24, %s218_s24 }
   0xc   :  { %256 = vmatpush3.msra.mxu0 %v25_v7  ;;  %273 = vmatpush3.msra.mxu1 %v119_v14  ;;  %p282_p0 = scmp.ne.s32.totalorder %s218_s24, %s281_s2  ;;  %p287_p2 = scmp.lt.s32.totalorder %s281_s2, %s281_s2 }
   0xd   :  { %257 = vmatprep.subr.mxu0 %v303_v1 }
   0xe   :  { %258 = vmatpush3.msra.mxu0 %v24_v8  ;;  %p288_p3 = por %p287_p2, %p286_p1 }
   0xf   :  { %259 = vmatprep.subr.mxu0 %v303_v1 }
  0x10   :  { %260 = vmatpush3.msra.mxu0 %v23_v9  ;;  %p289_p4 = pnand %p288_p3, %p282_p0 }
  0x11   :  { %261 = vmatprep.subr.mxu0 %v303_v1 }
  0x12   :  { %262 = vmatpush3.msra.mxu0 %v22_v10 }
  0x13   :  { %264 = vmatmul.mubr.msk.f32.vlgmr.msra.gmra.mxu0 %vm38_vm2, %v21_v11 }
  0xd3   :  { %v112_v16 = vpop.f32.mrf.mxu0 }
  0xd4   :  { %v113_v17 = vadd.f32 %v225_v15, %v112_v16 }
  0xd5   :  { %v265_v18 = vpop.f32.mrf.mxu0 }
  0xd6   :  { %vm116_vm3 = vcmp.gt.f32.partialorder %v113_v17, 0.0  ;;  %v117_v19 = vmul.f32 0.01, %v113_v17 }
  0xd8   :  { %v118_v20 = vsel %vm116_vm3, %v113_v17, %v117_v19 }
  0xd9   :  { %275 = vmatmul.mubr.msk.f32.vlgmr.msra.gmra.mxu1 %vm130_vm4, %v118_v20  ;;  %204 = vrot.lane.b32.xlu0 %v118_v20, %s305_s21 }
 0x14b   :  { %v205_v24 = vpop.permute.xlu0 %204 }
 0x199   :  { %v200_v22 = vpop.f32.mrf.mxu1 }
 0x19a   :  { %v201_v23 = vadd.f32 %v228_v21, %v200_v22 }
 0x19b   :  { %v276_v25 = vpop.f32.mrf.mxu1 }
 0x19c   :  { %v207_v26 = vsel %vm38_vm2, %v201_v23, %v205_v24 }
 0x19d   :  { %v209_v27 = vsel %vm208_vm5, %v207_v26, 0.0 }
 0x19e   :  { %210 = vst [vmem:[#allocation2] sm:$0xff] %v209_v27 }
 0x19f   :  { %292 = shalt.err (!%p289_p4)
}
 0x1a0   :  { %220 = dma.vmem_to_hbm [thread:$0]  %s218_s24, 128, %s395_s5, [#allocation3]  }
 0x1a1   :  { %301 = dma.done.wait [#allocation3], 128  }
 0x1a2   :  { %302 = vsyncadd [#allocation3], 4294967168 }
 0x1a3   :  { %224 = vsyncpa [#allocation3], 1 }

</bundles_post_ra>
